<compile_context>
chip_gen: v6e
topology: v6e:2x2x1
jax: 0.10.0
libtpu: 0.0.40
codegen_flags: <defaults>
</compile_context>

<pallas_src>
import jax
import jax.numpy as jnp
from jax.experimental import pallas as pl
from jax.experimental.pallas import tpu as pltpu

# Preferred lane widths (largest first); all multiples of 128 so stores are
# unmasked, full-width vst.
_LANE_CANDIDATES = (2048, 1024, 512, 256, 128)
# Sublane alignment of 32 keeps bf16/f16 (16-packed) and int8/fp8 (32-packed)
# tiles aligned so the cast is a pure vreg-width convert.
_ROW_ALIGN = 32
# Below this output size, pallas_call launch + per-step cost dominates.
_SMALL_BYPASS_OUT_BYTES = 1 * 1024 * 1024


def _target_out_tile_bytes() -> int:
    """Per-grid-step f32 output tile budget (generation aware)."""
    try:
        info = pltpu.get_tpu_info()
        # v7x HBM (~3.2 TB/s) eats the fixed per-step overhead ~2.3x faster
        # than v6e, so use bigger tiles there. 2 x (8 MiB out + <=8 MiB in)
        # double-buffered still fits v7x's 64 MiB physical VMEM comfortably.
        if "7" in str(getattr(info, "chip_version", "")):
            return 8 * 1024 * 1024
    except Exception:
        pass
    # 4 MiB out + <=4 MiB in, double-buffered (<=16 MiB) works on every gen.
    return 4 * 1024 * 1024


def _cast_kernel(x_ref, o_ref):
    # Elementwise convert on the VPU; compute is never the bottleneck.
    o_ref[...] = x_ref[...].astype(jnp.float32)


def _align_up(v: int, m: int) -> int:
    return ((v + m - 1) // m) * m


def _run_tiled_cast(x2: jax.Array) -> jax.Array:
    """Cast a 2D (R, C) slab to float32 with a row-tiled, pipelined grid."""
    R, C = x2.shape
    in_itemsize = x2.dtype.itemsize

    tile_r = max(1, _target_out_tile_bytes() // (C * 4))
    if tile_r >= R:
        # Whole array would fit one tile. Still force >=2 grid steps when the
        # row extent allows it: a single step fully serializes DMA-in -> cast
        # -> DMA-out and leaves one v7x TensorCore idle on the "parallel" axis.
        if R >= 2 * _ROW_ALIGN:
            tile_r = _align_up(pl.cdiv(R, 2), _ROW_ALIGN)  # -> exactly 2 steps
        else:
            tile_r = R  # tiny: full-extent block, single step
    else:
        tile_r = max(_ROW_ALIGN, (tile_r // _ROW_ALIGN) * _ROW_ALIGN)

    grid_r = pl.cdiv(R, tile_r)

    in_tile_bytes = tile_r * C * in_itemsize
    out_tile_bytes = tile_r * C * 4
    # Double-buffered input + output tiles, plus headroom for internal scratch.
    vmem_limit = int(2 * (in_tile_bytes + out_tile_bytes) + (4 << 20))

    in_bytes = R * C * in_itemsize
    out_bytes = R * C * 4

    # TODO(synk): if xprof ever shows an exposed read stream at fill/drain,
    # sweep pipeline_mode=pl.Buffered(3) on the input spec; depth-2 default
    # already saturates HBM for a pure streaming cast in practice.
    return pl.pallas_call(
        _cast_kernel,
        out_shape=jax.ShapeDtypeStruct((R, C), jnp.float32),
        grid_spec=pl.GridSpec(
            grid=(grid_r,),
            in_specs=[pl.BlockSpec((tile_r, C), lambda i: (i, 0))],
            out_specs=pl.BlockSpec((tile_r, C), lambda i: (i, 0)),
        ),
        compiler_params=pltpu.CompilerParams(
            dimension_semantics=("parallel",),
            vmem_limit_bytes=vmem_limit,
        ),
        cost_estimate=pl.CostEstimate(
            flops=0, transcendentals=0, bytes_accessed=in_bytes + out_bytes
        ),
    )(x2)


def tofp32(x: jax.Array) -> jax.Array:
    """Cast any-dtype input to float32, matching torch `input.float()`."""
    # No-op cast: skip the HBM round trip entirely (matches .float() aliasing).
    if x.dtype == jnp.float32:
        return x

    orig_shape = x.shape
    n = x.size
    # Tiny tensors: Pallas launch overhead dominates; XLA convert is optimal.
    if n == 0 or n * 4 < _SMALL_BYPASS_OUT_BYTES:
        return x.astype(jnp.float32)

    flat = x.reshape(-1)

    # Pick the largest lane width that divides the element count exactly.
    for lane in _LANE_CANDIDATES:
        if n % lane == 0:
            y2 = _run_tiled_cast(flat.reshape(-1, lane))
            return y2.reshape(orig_shape)

    # Ragged element count: run the lane-aligned prefix through the slab
    # kernel and cast the (< 2048-element) tail with a trivial astype, instead
    # of jnp.pad-ing the whole flat array (which re-reads/re-writes every
    # input byte in HBM before the kernel even starts).
    lane = _LANE_CANDIDATES[0]
    prefix = (n // lane) * lane
    if prefix == 0:
        return x.astype(jnp.float32)
    y_head = _run_tiled_cast(flat[:prefix].reshape(-1, lane)).reshape(-1)
    y_tail = flat[prefix:].astype(jnp.float32)
    return jnp.concatenate([y_head, y_tail]).reshape(orig_shape)


if __name__ == "__main__":
    key = jax.random.PRNGKey(0)
    k1, k2, k3, k4 = jax.random.split(key, 4)

    # 1) Small NCHW input (module's typical shape): exercises the tiny-input
    #    bypass path.
    x_small = jax.random.normal(k1, (2, 4, 16, 16), dtype=jnp.bfloat16)
    y_small = tofp32(x_small)
    jax.block_until_ready(y_small)
    assert y_small.dtype == jnp.float32
    assert y_small.shape == x_small.shape
    assert jnp.array_equal(y_small, x_small.astype(jnp.float32)), \
        "mismatch on small bf16 input"

    # 2) Medium lane-aligned input: exercises the pipelined Pallas kernel with
    #    a forced >=2-step grid (read/write DMA overlap, megacore sharding).
    x_med = jax.random.normal(k2, (8, 16, 64, 64), dtype=jnp.bfloat16)
    y_med = tofp32(x_med)
    jax.block_until_ready(y_med)
    assert y_med.dtype == jnp.float32
    assert y_med.shape == x_med.shape
    assert jnp.array_equal(y_med, x_med.astype(jnp.float32)), \
        "mismatch on medium bf16 input (kernel path)"

    # 3) Larger ragged element count: exercises the prefix-kernel + tail-cast
    #    path (no whole-array pad) including a partial last grid block.
    x_rag = jax.random.normal(k3, (300, 1021), dtype=jnp.float16)
    y_rag = tofp32(x_rag)
    jax.block_until_ready(y_rag)
    assert y_rag.dtype == jnp.float32
    assert y_rag.shape == x_rag.shape
    assert jnp.array_equal(y_rag, x_rag.astype(jnp.float32)), \
        "mismatch on ragged f16 input (prefix/tail path)"

    # 4) Small ragged input: bypass path with a non-multiple-of-128 count.
    x_sr = jax.random.normal(k4, (3, 5, 7, 11), dtype=jnp.float16)
    y_sr = tofp32(x_sr)
    jax.block_until_ready(y_sr)
    assert y_sr.dtype == jnp.float32
    assert y_sr.shape == x_sr.shape
    assert jnp.array_equal(y_sr, x_sr.astype(jnp.float32)), \
        "mismatch on small ragged f16 input"

    print("KERNEL_OK")
</pallas_src>

<mosaic_0001>
module attributes {stable_mosaic.version = 11 : i64} {
  func.func @_cast_kernel(%arg0: i32, %arg1: memref<128x2048xbf16, #tpu.memory_space<vmem>>, %arg2: memref<128x2048xf32, #tpu.memory_space<vmem>>) attributes {dimension_semantics = [#tpu.dimension_semantics<parallel>], iteration_bounds = array<i64: 2>, scalar_prefetch = 0 : i64, scratch_operands = 0 : i64, tpu.core_type = #tpu.core_type<tc>, window_params = [{transform_indices = @transform_0, window_bounds = array<i64: 128, 2048>}, {transform_indices = @transform_1, window_bounds = array<i64: 128, 2048>}]} {
    %c0 = arith.constant 0 : index
    %c0_0 = arith.constant 0 : index
    %0 = vector.load %arg1[%c0, %c0_0] : memref<128x2048xbf16, #tpu.memory_space<vmem>>, vector<128x2048xbf16>
    %1 = arith.extf %0 : vector<128x2048xbf16> to vector<128x2048xf32>
    %c0_1 = arith.constant 0 : index
    %c0_2 = arith.constant 0 : index
    %2 = vector.load %arg2[%c0_1, %c0_2] : memref<128x2048xf32, #tpu.memory_space<vmem>>, vector<128x2048xf32>
    tpu.vector_store %arg2[%c0_1, %c0_2], %1 {strides = array<i32>} : memref<128x2048xf32, #tpu.memory_space<vmem>>, vector<128x2048xf32>,
    return
  }
  func.func @transform_0(%arg0: i32) -> (i32, i32) {
    %c0_i32 = arith.constant 0 : i32
    %c0_i32_0 = arith.constant 0 : i32
    return %arg0, %c0_i32 : i32, i32
  }
  func.func @transform_1(%arg0: i32) -> (i32, i32) {
    %c0_i32 = arith.constant 0 : i32
    %c0_i32_0 = arith.constant 0 : i32
    return %arg0, %c0_i32 : i32, i32
  }
}

</mosaic_0001>

<bundles_post_ra>
// kernel: tpu_custom_call.1
= control target key start
LH: loop header
LB: loop body
LE: loop exit
PB: predicated region body
PF: predicated region fallthrough
CT: control target
= control target key end

     0   :  { %6 = vsyncpa [#allocation3], 0  ;;  %s1590_s0 = inlined_call_operand.hbm [shape: bf16[256,2048], index: 0, kind: input, shape index: {}]   ;;  %s1591_s1 = inlined_call_operand.hbm [shape: f32[256,2048], index: 1, kind: output, shape index: {}]  }
   0x1   :  { %8 = vsyncpa [#allocation3 + $0x1], 0 }
   0x2   :  { %9 = vsyncpa [#allocation4], 0 }
   0x3   :  { %11 = vsyncpa [#allocation4 + $0x1], 0  ;;  %s1046_s6 = smov 0   ;;  %s1048_s7 = smov 0  }
   0x4   :  { %s1050_s8 = smov 0   ;;  %s1052_s9 = smov 0  }
   0x5 LB: > { %s1067_s10 = sadd.s32 4294967295, %s1028_s9   ;;  %s866_s11 = sadd.s32 4294967294, %s1028_s9   ;;  %s1028_s9 = sphi %s1052_s9, %s1606_s9   ;;  %s1024_s8 = sphi %s1050_s8, %s1605_s8   ;;  %s1020_s7 = sphi %s1048_s7, %s1604_s7   ;;  %s1016_s6 = sphi %s1046_s6, %s1603_s6  }
   0x6   : > { %s1071_s12 = sadd.s32 1, %s1028_s9   ;;  %s24_s13 = sadd.s32 1, %s1024_s8 }
   0x7   : > { %s21_s14 = ssub.s32 %s1028_s9, %s1071_s12  ;;  %p31_p0 = scmp.ne.s32.totalorder %s1024_s8, %s1020_s7 }
   0x8   : > { %p22_p1 = scmp.eq.s32.totalorder %s21_s14, 0  ;;  %p32_p2 = scmp.eq.s32.totalorder %s1028_s9, 0 }
   0x9   : > { %p37_p3 = scmp.ne.s32.totalorder %s1020_s7, %s1016_s6  ;;  %p38_p4 = scmp.eq.s32.totalorder %s1067_s10, 0 }
   0xa   : > { %s1083_s15 = scalar_select %p22_p1, %s1024_s8, %s24_s13  }
   0xb   : > { %p1085_p5 = por %p32_p2, %p31_p0  ;;  %p1089_p6 = por %p38_p4, %p37_p3 }
   0xc   : > { %p61_p7 = scmp.eq.s32.totalorder %s1067_s10, 1  ;;  %p67_p8 = scmp.eq.s32.totalorder %s866_s11, 1 }
   0xd   : > { %s1595_s17 = scalar_select %p1089_p6, 1, 0 }
   0xe   : > { %p898_p10 = scmp.lt.s32.totalorder %s1028_s9, 2  ;;  %p1096_p11 = por %p61_p7, %p31_p0 }
   0xf   : > { %p1100_p12 = por %p67_p8, %p37_p3  ;;  %s87_s20 = sand.u32 1, %s1024_s8  }
  0x10   : > { %s1596_s18 = scalar_select %p1096_p11, 1, 0 }
  0x11   : > { %s1597_s19 = scalar_select %p1100_p12, 1, 0 }
  0x12   : > { %s883_s21 = sshll.u32 %s1028_s9, 14  ;;  %s869_s22 = sshll.u32 %s87_s20, 10 }
  0x13   : > { %s1109_s25 = scalar_lea.hbm %s1590_s0, %s883_s21  ;;  %s91_s26 = scalar_lea.vmem [#allocation2], %s869_s22 }
  0x14   : > { %s99_s27 = sshll.u32 %s91_s26, 4  ;;  %p1113_p13 = pnand %p898_p10, %p1085_p5  ;;  %s1117_s27 = int_to_ptr.vmem [resolvable:$true] %s99_s27 }
  0x15   : > { %s1119_s29 = scalar_lea.sflag [#allocation3], %s87_s20  ;;  %s936_s30 = scalar_lea.hbm %s1109_s25, 16384 }
  0x16   : > { %p937_p0 = scmp.ne.s32.totalorder %s1109_s25, %s936_s30  ;;  %p938_p1 = pneg %p1113_p13 }
  0x17   : > { %s941_s4 = scalar_lea.hbm %s1590_s0, 32768  ;;  %p942_p4 = scmp.lt.s32.totalorder %s1109_s25, %s1590_s0 }
  0x18   : > { %p939_p2 = pnand %p938_p1, %p937_p0  ;;  %p943_p5 = scmp.lt.s32.totalorder %s941_s4, %s936_s30 }
  0x1a   : > { %p940_p3 = pneg %p939_p2  ;;  %p944_p7 = por %p943_p5, %p942_p4 }
  0x1c   : > { %p945_p8 = pnand %p944_p7, %p940_p3 }
  0x1e   : > { %948 = shalt.err (!%p945_p8)
}
  0x1f   : > { %s949_s13 = scalar_lea.vmem %s1117_s27, 16384  ;;  %s1030_s14 = smov [#allocation2]  }
  0x20   : > { %p950_p10 = scmp.ne.s32.totalorder %s1117_s27, %s949_s13  ;;  %s954_s16 = sshll.u32 %s1030_s14, 4  ;;  %s955_s16 = int_to_ptr.vmem [resolvable:$false] %s954_s16 }
  0x21   : > { %s956_s20 = scalar_lea.vmem %s955_s16, 32768  ;;  %p957_p2 = scmp.lt.s32.totalorder %s1117_s27, %s955_s16 }
  0x22   : > { %p952_p9 = pnand %p950_p10, %p938_p1  ;;  %p958_p12 = scmp.lt.s32.totalorder %s956_s20, %s949_s13 }
  0x24   : > { %p953_p0 = pneg %p952_p9  ;;  %p959_p11 = por %p958_p12, %p957_p2 }
  0x26   : > { %p960_p6 = pnand %p959_p11, %p953_p0 }
  0x28   : > { %963 = shalt.err (!%p960_p6)
}
  0x29   : > { %s1031_s21 = smov 1024   ;;  %s1032_s22 = smov 64  }
  0x2a   : > { %893 = dma.hbm_to_vmem [thread:$0]  (!%p1113_p13), %s1109_s25, 16384, %s1117_s27, %s1119_s29, %s1031_s21, %s1031_s21, %s1032_s22  }
  0x2b   : > { %p873_p9 = scmp.ge.s32.totalorder %s1028_s9, 1  ;;  %p107_p1 = scmp.lt.s32.totalorder %s1028_s9, 3 }
  0x2d   : > { %p108_p3 = pnand %p873_p9, %p107_p1 }
  0x2e   : > { %s1143_s23 = sand.u32 (!%p108_p3), 1, %s1020_s7   ;;  %p1599_p6 = scmp.ne.s32.totalorder (!%p108_p3), %s1595_s17, 0 }
  0x2f   : > { %111 = sbr.rel (%p108_p3) target bundleno = 197 (0xc5), region = 24  ;;  %s874_s24 = sshll.u32 (!%p108_p3), %s1143_s23, 10 }
  0x30   : > { %s114_s26 = scalar_lea.sflag (!%p108_p3), [#allocation3], %s1143_s23  ;;  %s1147_s30 = scalar_lea.vmem (!%p108_p3), [#allocation2], %s874_s24 }
  0x34   : > { %1007 = dma.done.wait (%p1599_p6), %s114_s26, 16384  }
  0x35   : > { %1009 = vsyncadd (%p1599_p6), %s114_s26, 4294950912  ;;  %s875_s25 = sshll.u32 %s1143_s23, 11  ;;  %v138_v0 = vld [vmem:[%s1147_s30] sm:$0xff]  ;;  %v139_v1 = vld [vmem:[%s1147_s30 + $0x8] sm:$0xff]  ;;  %s885_s27 = sshll.u32 %s1067_s10, 15 }
  0x36   : > { %v140_v2 = vld [vmem:[%s1147_s30 + $0x10] sm:$0xff]  ;;  %v266_v3 = vunpack.c.l.bf16 %v138_v0  ;;  %v267_v4 = vunpack.c.h.bf16 %v138_v0  ;;  %v268_v5 = vunpack.c.l.bf16 %v139_v1  ;;  %v269_v6 = vunpack.c.h.bf16 %v139_v1  ;;  %v141_v7 = vld [vmem:[%s1147_s30 + $0x18] sm:$0xff]  ;;  %v142_v8 = vld [vmem:[%s1147_s30 + $0x20] sm:$0xff]  ;;  %s1163_s17 = scalar_lea.vmem [#allocation5], %s875_s25  ;;  %s1533_s2 = scalar_lea.hbm %s1591_s1, %s885_s27 }
  0x37   : > { %v143_v9 = vld [vmem:[%s1147_s30 + $0x28] sm:$0xff]  ;;  %v270_v10 = vunpack.c.l.bf16 %v140_v2  ;;  %v271_v11 = vunpack.c.h.bf16 %v140_v2  ;;  %v272_v12 = vunpack.c.l.bf16 %v141_v7  ;;  %v273_v13 = vunpack.c.h.bf16 %v141_v7  ;;  %v144_v14 = vld [vmem:[%s1147_s30 + $0x30] sm:$0xff]  ;;  %v145_v15 = vld [vmem:[%s1147_s30 + $0x38] sm:$0xff]  ;;  %s793_s28 = sshll.u32 %s1163_s17, 4  ;;  %s779_s3 = scalar_lea.sflag [#allocation4], %s1143_s23  ;;  %s1535_s28 = int_to_ptr.vmem [resolvable:$true] %s793_s28 }
  0x38   : > { %v146_v16 = vld [vmem:[%s1147_s30 + $0x40] sm:$0xff]  ;;  %522 = vst [vmem:[%s1163_s17] sm:$0xff] %v266_v3  ;;  %523 = vst [vmem:[%s1163_s17 + $0x8] sm:$0xff] %v267_v4  ;;  %v274_v17 = vunpack.c.l.bf16 %v142_v8  ;;  %v275_v18 = vunpack.c.h.bf16 %v142_v8  ;;  %v276_v19 = vunpack.c.l.bf16 %v143_v9  ;;  %v277_v20 = vunpack.c.h.bf16 %v143_v9  ;;  %v147_v21 = vld [vmem:[%s1147_s30 + $0x48] sm:$0xff]  ;;  %s964_s4 = scalar_lea.vmem %s1535_s28, 32768  ;;  %p1600_p12 = scmp.ne.s32.totalorder %s1596_s18, 0 }
  0x39   : > { %524 = vst [vmem:[%s1163_s17 + $0x10] sm:$0xff] %v268_v5  ;;  %525 = vst [vmem:[%s1163_s17 + $0x18] sm:$0xff] %v269_v6  ;;  %v148_v22 = vld [vmem:[%s1147_s30 + $0x50] sm:$0xff]  ;;  %v149_v23 = vld [vmem:[%s1147_s30 + $0x58] sm:$0xff]  ;;  %v278_v24 = vunpack.c.l.bf16 %v144_v14  ;;  %v279_v25 = vunpack.c.h.bf16 %v144_v14  ;;  %v280_v26 = vunpack.c.l.bf16 %v145_v15  ;;  %v281_v27 = vunpack.c.h.bf16 %v145_v15  ;;  %p965_p11 = scmp.ne.s32.totalorder %s1535_s28, %s964_s4  ;;  %s1033_s5 = smov [#allocation5]  }
  0x3a   : > { %526 = vst [vmem:[%s1163_s17 + $0x20] sm:$0xff] %v270_v10  ;;  %527 = vst [vmem:[%s1163_s17 + $0x28] sm:$0xff] %v271_v11  ;;  %v150_v28 = vld [vmem:[%s1147_s30 + $0x60] sm:$0xff]  ;;  %v151_v29 = vld [vmem:[%s1147_s30 + $0x68] sm:$0xff]  ;;  %v282_v30 = vunpack.c.l.bf16 %v146_v16  ;;  %v283_v31 = vunpack.c.h.bf16 %v146_v16  ;;  %v284_v32 = vunpack.c.l.bf16 %v147_v21  ;;  %v285_v33 = vunpack.c.h.bf16 %v147_v21  ;;  %s968_s11 = sshll.u32 %s1033_s5, 4  ;;  %s969_s11 = int_to_ptr.vmem [resolvable:$false] %s968_s11 }
  0x3b   : > { %528 = vst [vmem:[%s1163_s17 + $0x30] sm:$0xff] %v272_v12  ;;  %529 = vst [vmem:[%s1163_s17 + $0x38] sm:$0xff] %v273_v13  ;;  %v152_v34 = vld [vmem:[%s1147_s30 + $0x70] sm:$0xff]  ;;  %v153_v35 = vld [vmem:[%s1147_s30 + $0x78] sm:$0xff]  ;;  %v286_v36 = vunpack.c.l.bf16 %v148_v22  ;;  %v287_v37 = vunpack.c.h.bf16 %v148_v22  ;;  %v288_v38 = vunpack.c.l.bf16 %v149_v23  ;;  %v289_v39 = vunpack.c.h.bf16 %v149_v23  ;;  %p966_p13 = pnand %p965_p11, %p1600_p12  ;;  %s970_s13 = scalar_lea.vmem %s969_s11, 65536 }
  0x3c   : > { %530 = vst [vmem:[%s1163_s17 + $0x40] sm:$0xff] %v274_v17  ;;  %531 = vst [vmem:[%s1163_s17 + $0x48] sm:$0xff] %v275_v18  ;;  %v154_v40 = vld [vmem:[%s1147_s30 + $0x80] sm:$0xff]  ;;  %v155_v41 = vld [vmem:[%s1147_s30 + $0x88] sm:$0xff]  ;;  %v290_v42 = vunpack.c.l.bf16 %v150_v28  ;;  %v291_v43 = vunpack.c.h.bf16 %v150_v28  ;;  %v292_v44 = vunpack.c.l.bf16 %v151_v29  ;;  %v293_v45 = vunpack.c.h.bf16 %v151_v29  ;;  %p971_p5 = scmp.lt.s32.totalorder %s1535_s28, %s969_s11  ;;  %p972_p7 = scmp.lt.s32.totalorder %s970_s13, %s964_s4 }
  0x3d   : > { %532 = vst [vmem:[%s1163_s17 + $0x50] sm:$0xff] %v276_v19  ;;  %533 = vst [vmem:[%s1163_s17 + $0x58] sm:$0xff] %v277_v20  ;;  %v156_v46 = vld [vmem:[%s1147_s30 + $0x90] sm:$0xff]  ;;  %v157_v47 = vld [vmem:[%s1147_s30 + $0x98] sm:$0xff]  ;;  %v294_v48 = vunpack.c.l.bf16 %v152_v34  ;;  %v295_v49 = vunpack.c.h.bf16 %v152_v34  ;;  %v296_v50 = vunpack.c.l.bf16 %v153_v35  ;;  %v297_v51 = vunpack.c.h.bf16 %v153_v35  ;;  %p967_p4 = pneg %p966_p13 }
  0x3e   : > { %534 = vst [vmem:[%s1163_s17 + $0x60] sm:$0xff] %v278_v24  ;;  %535 = vst [vmem:[%s1163_s17 + $0x68] sm:$0xff] %v279_v25  ;;  %v158_v52 = vld [vmem:[%s1147_s30 + $0xa0] sm:$0xff]  ;;  %v159_v53 = vld [vmem:[%s1147_s30 + $0xa8] sm:$0xff]  ;;  %v298_v54 = vunpack.c.l.bf16 %v154_v40  ;;  %v299_v55 = vunpack.c.h.bf16 %v154_v40  ;;  %v300_v56 = vunpack.c.l.bf16 %v155_v41  ;;  %v301_v57 = vunpack.c.h.bf16 %v155_v41  ;;  %p973_p8 = por %p972_p7, %p971_p5 }
  0x3f   : > { %536 = vst [vmem:[%s1163_s17 + $0x70] sm:$0xff] %v280_v26  ;;  %537 = vst [vmem:[%s1163_s17 + $0x78] sm:$0xff] %v281_v27  ;;  %v160_v58 = vld [vmem:[%s1147_s30 + $0xb0] sm:$0xff]  ;;  %v161_v59 = vld [vmem:[%s1147_s30 + $0xb8] sm:$0xff]  ;;  %v302_v60 = vunpack.c.l.bf16 %v156_v46  ;;  %v303_v61 = vunpack.c.h.bf16 %v156_v46  ;;  %v304_v62 = vunpack.c.l.bf16 %v157_v47  ;;  %v305_v63 = vunpack.c.h.bf16 %v157_v47 }
  0x40   : > { %538 = vst [vmem:[%s1163_s17 + $0x80] sm:$0xff] %v282_v30  ;;  %539 = vst [vmem:[%s1163_s17 + $0x88] sm:$0xff] %v283_v31  ;;  %v162_v0 = vld [vmem:[%s1147_s30 + $0xc0] sm:$0xff]  ;;  %v163_v1 = vld [vmem:[%s1147_s30 + $0xc8] sm:$0xff]  ;;  %v306_v2 = vunpack.c.l.bf16 %v158_v52  ;;  %v307_v3 = vunpack.c.h.bf16 %v158_v52  ;;  %v308_v4 = vunpack.c.l.bf16 %v159_v53  ;;  %v309_v5 = vunpack.c.h.bf16 %v159_v53  ;;  %p974_p10 = pnand %p973_p8, %p967_p4 }
  0x41   : > { %540 = vst [vmem:[%s1163_s17 + $0x90] sm:$0xff] %v284_v32  ;;  %541 = vst [vmem:[%s1163_s17 + $0x98] sm:$0xff] %v285_v33  ;;  %v164_v6 = vld [vmem:[%s1147_s30 + $0xd0] sm:$0xff]  ;;  %v165_v7 = vld [vmem:[%s1147_s30 + $0xd8] sm:$0xff]  ;;  %v310_v8 = vunpack.c.l.bf16 %v160_v58  ;;  %v311_v9 = vunpack.c.h.bf16 %v160_v58  ;;  %v312_v10 = vunpack.c.l.bf16 %v161_v59  ;;  %v313_v11 = vunpack.c.h.bf16 %v161_v59 }
  0x42   : > { %542 = vst [vmem:[%s1163_s17 + $0xa0] sm:$0xff] %v286_v36  ;;  %543 = vst [vmem:[%s1163_s17 + $0xa8] sm:$0xff] %v287_v37  ;;  %v166_v12 = vld [vmem:[%s1147_s30 + $0xe0] sm:$0xff]  ;;  %v167_v13 = vld [vmem:[%s1147_s30 + $0xe8] sm:$0xff]  ;;  %v314_v14 = vunpack.c.l.bf16 %v162_v0  ;;  %v315_v15 = vunpack.c.h.bf16 %v162_v0  ;;  %v316_v16 = vunpack.c.l.bf16 %v163_v1  ;;  %v317_v17 = vunpack.c.h.bf16 %v163_v1 }
  0x43   : > { %544 = vst [vmem:[%s1163_s17 + $0xb0] sm:$0xff] %v288_v38  ;;  %545 = vst [vmem:[%s1163_s17 + $0xb8] sm:$0xff] %v289_v39  ;;  %v168_v18 = vld [vmem:[%s1147_s30 + $0xf0] sm:$0xff]  ;;  %v169_v19 = vld [vmem:[%s1147_s30 + $0xf8] sm:$0xff]  ;;  %v318_v20 = vunpack.c.l.bf16 %v164_v6  ;;  %v319_v21 = vunpack.c.h.bf16 %v164_v6  ;;  %v320_v22 = vunpack.c.l.bf16 %v165_v7  ;;  %v321_v23 = vunpack.c.h.bf16 %v165_v7 }
  0x44   : > { %546 = vst [vmem:[%s1163_s17 + $0xc0] sm:$0xff] %v290_v42  ;;  %547 = vst [vmem:[%s1163_s17 + $0xc8] sm:$0xff] %v291_v43  ;;  %v170_v24 = vld [vmem:[%s1147_s30 + $0x100] sm:$0xff]  ;;  %v171_v25 = vld [vmem:[%s1147_s30 + $0x108] sm:$0xff]  ;;  %v322_v26 = vunpack.c.l.bf16 %v166_v12  ;;  %v323_v27 = vunpack.c.h.bf16 %v166_v12  ;;  %v324_v28 = vunpack.c.l.bf16 %v167_v13  ;;  %v325_v29 = vunpack.c.h.bf16 %v167_v13 }
  0x45   : > { %548 = vst [vmem:[%s1163_s17 + $0xd0] sm:$0xff] %v292_v44  ;;  %549 = vst [vmem:[%s1163_s17 + $0xd8] sm:$0xff] %v293_v45  ;;  %v172_v30 = vld [vmem:[%s1147_s30 + $0x110] sm:$0xff]  ;;  %v173_v31 = vld [vmem:[%s1147_s30 + $0x118] sm:$0xff]  ;;  %v326_v32 = vunpack.c.l.bf16 %v168_v18  ;;  %v327_v33 = vunpack.c.h.bf16 %v168_v18  ;;  %v328_v34 = vunpack.c.l.bf16 %v169_v19  ;;  %v329_v35 = vunpack.c.h.bf16 %v169_v19 }
  0x46   : > { %550 = vst [vmem:[%s1163_s17 + $0xe0] sm:$0xff] %v294_v48  ;;  %551 = vst [vmem:[%s1163_s17 + $0xe8] sm:$0xff] %v295_v49  ;;  %v174_v36 = vld [vmem:[%s1147_s30 + $0x120] sm:$0xff]  ;;  %v175_v37 = vld [vmem:[%s1147_s30 + $0x128] sm:$0xff]  ;;  %v330_v38 = vunpack.c.l.bf16 %v170_v24  ;;  %v331_v39 = vunpack.c.h.bf16 %v170_v24  ;;  %v332_v40 = vunpack.c.l.bf16 %v171_v25  ;;  %v333_v41 = vunpack.c.h.bf16 %v171_v25 }
  0x47   : > { %552 = vst [vmem:[%s1163_s17 + $0xf0] sm:$0xff] %v296_v50  ;;  %553 = vst [vmem:[%s1163_s17 + $0xf8] sm:$0xff] %v297_v51  ;;  %v176_v42 = vld [vmem:[%s1147_s30 + $0x130] sm:$0xff]  ;;  %v177_v43 = vld [vmem:[%s1147_s30 + $0x138] sm:$0xff]  ;;  %v334_v44 = vunpack.c.l.bf16 %v172_v30  ;;  %v335_v45 = vunpack.c.h.bf16 %v172_v30  ;;  %v336_v46 = vunpack.c.l.bf16 %v173_v31  ;;  %v337_v47 = vunpack.c.h.bf16 %v173_v31 }
  0x48   : > { %554 = vst [vmem:[%s1163_s17 + $0x100] sm:$0xff] %v298_v54  ;;  %555 = vst [vmem:[%s1163_s17 + $0x108] sm:$0xff] %v299_v55  ;;  %v178_v48 = vld [vmem:[%s1147_s30 + $0x140] sm:$0xff]  ;;  %v179_v49 = vld [vmem:[%s1147_s30 + $0x148] sm:$0xff]  ;;  %v338_v50 = vunpack.c.l.bf16 %v174_v36  ;;  %v339_v51 = vunpack.c.h.bf16 %v174_v36  ;;  %v340_v52 = vunpack.c.l.bf16 %v175_v37  ;;  %v341_v53 = vunpack.c.h.bf16 %v175_v37 }
  0x49   : > { %556 = vst [vmem:[%s1163_s17 + $0x110] sm:$0xff] %v300_v56  ;;  %557 = vst [vmem:[%s1163_s17 + $0x118] sm:$0xff] %v301_v57  ;;  %v180_v54 = vld [vmem:[%s1147_s30 + $0x150] sm:$0xff]  ;;  %v181_v55 = vld [vmem:[%s1147_s30 + $0x158] sm:$0xff]  ;;  %v342_v56 = vunpack.c.l.bf16 %v176_v42  ;;  %v343_v57 = vunpack.c.h.bf16 %v176_v42  ;;  %v344_v58 = vunpack.c.l.bf16 %v177_v43  ;;  %v345_v59 = vunpack.c.h.bf16 %v177_v43 }
  0x4a   : > { %558 = vst [vmem:[%s1163_s17 + $0x120] sm:$0xff] %v302_v60  ;;  %559 = vst [vmem:[%s1163_s17 + $0x128] sm:$0xff] %v303_v61  ;;  %v182_v60 = vld [vmem:[%s1147_s30 + $0x160] sm:$0xff]  ;;  %v183_v61 = vld [vmem:[%s1147_s30 + $0x168] sm:$0xff]  ;;  %v348_v0 = vunpack.c.l.bf16 %v179_v49  ;;  %v349_v1 = vunpack.c.h.bf16 %v179_v49  ;;  %v352_v6 = vunpack.c.l.bf16 %v181_v55  ;;  %v353_v7 = vunpack.c.h.bf16 %v181_v55 }
  0x4b   : > { %560 = vst [vmem:[%s1163_s17 + $0x130] sm:$0xff] %v304_v62  ;;  %561 = vst [vmem:[%s1163_s17 + $0x138] sm:$0xff] %v305_v63  ;;  %v346_v62 = vunpack.c.l.bf16 %v178_v48  ;;  %v347_v63 = vunpack.c.h.bf16 %v178_v48  ;;  %v356_v12 = vunpack.c.l.bf16 %v183_v61  ;;  %v357_v13 = vunpack.c.h.bf16 %v183_v61 }
  0x4c   : > { %562 = vst [vmem:[%s1163_s17 + $0x140] sm:$0xff] %v306_v2  ;;  %563 = vst [vmem:[%s1163_s17 + $0x148] sm:$0xff] %v307_v3  ;;  %v184_v2 = vld [vmem:[%s1147_s30 + $0x170] sm:$0xff]  ;;  %v185_v3 = vld [vmem:[%s1147_s30 + $0x178] sm:$0xff] }
  0x4d   : > { %564 = vst [vmem:[%s1163_s17 + $0x150] sm:$0xff] %v308_v4  ;;  %565 = vst [vmem:[%s1163_s17 + $0x158] sm:$0xff] %v309_v5  ;;  %v350_v4 = vunpack.c.l.bf16 %v180_v54  ;;  %v351_v5 = vunpack.c.h.bf16 %v180_v54  ;;  %v360_v18 = vunpack.c.l.bf16 %v185_v3  ;;  %v361_v19 = vunpack.c.h.bf16 %v185_v3 }
  0x4e   : > { %566 = vst [vmem:[%s1163_s17 + $0x160] sm:$0xff] %v310_v8  ;;  %567 = vst [vmem:[%s1163_s17 + $0x168] sm:$0xff] %v311_v9  ;;  %v186_v8 = vld [vmem:[%s1147_s30 + $0x180] sm:$0xff]  ;;  %v187_v9 = vld [vmem:[%s1147_s30 + $0x188] sm:$0xff] }
  0x4f   : > { %568 = vst [vmem:[%s1163_s17 + $0x170] sm:$0xff] %v312_v10  ;;  %569 = vst [vmem:[%s1163_s17 + $0x178] sm:$0xff] %v313_v11  ;;  %v354_v10 = vunpack.c.l.bf16 %v182_v60  ;;  %v355_v11 = vunpack.c.h.bf16 %v182_v60  ;;  %v364_v24 = vunpack.c.l.bf16 %v187_v9  ;;  %v365_v25 = vunpack.c.h.bf16 %v187_v9 }
  0x50   : > { %570 = vst [vmem:[%s1163_s17 + $0x180] sm:$0xff] %v314_v14  ;;  %571 = vst [vmem:[%s1163_s17 + $0x188] sm:$0xff] %v315_v15  ;;  %v188_v14 = vld [vmem:[%s1147_s30 + $0x190] sm:$0xff]  ;;  %v189_v15 = vld [vmem:[%s1147_s30 + $0x198] sm:$0xff] }
  0x51   : > { %572 = vst [vmem:[%s1163_s17 + $0x190] sm:$0xff] %v316_v16  ;;  %573 = vst [vmem:[%s1163_s17 + $0x198] sm:$0xff] %v317_v17  ;;  %v358_v16 = vunpack.c.l.bf16 %v184_v2  ;;  %v359_v17 = vunpack.c.h.bf16 %v184_v2  ;;  %v368_v30 = vunpack.c.l.bf16 %v189_v15  ;;  %v369_v31 = vunpack.c.h.bf16 %v189_v15 }
  0x52   : > { %574 = vst [vmem:[%s1163_s17 + $0x1a0] sm:$0xff] %v318_v20  ;;  %575 = vst [vmem:[%s1163_s17 + $0x1a8] sm:$0xff] %v319_v21  ;;  %v190_v20 = vld [vmem:[%s1147_s30 + $0x1a0] sm:$0xff]  ;;  %v191_v21 = vld [vmem:[%s1147_s30 + $0x1a8] sm:$0xff] }
  0x53   : > { %576 = vst [vmem:[%s1163_s17 + $0x1b0] sm:$0xff] %v320_v22  ;;  %577 = vst [vmem:[%s1163_s17 + $0x1b8] sm:$0xff] %v321_v23  ;;  %v362_v22 = vunpack.c.l.bf16 %v186_v8  ;;  %v363_v23 = vunpack.c.h.bf16 %v186_v8  ;;  %v372_v36 = vunpack.c.l.bf16 %v191_v21  ;;  %v373_v37 = vunpack.c.h.bf16 %v191_v21 }
  0x54   : > { %578 = vst [vmem:[%s1163_s17 + $0x1c0] sm:$0xff] %v322_v26  ;;  %579 = vst [vmem:[%s1163_s17 + $0x1c8] sm:$0xff] %v323_v27  ;;  %v192_v26 = vld [vmem:[%s1147_s30 + $0x1b0] sm:$0xff]  ;;  %v193_v27 = vld [vmem:[%s1147_s30 + $0x1b8] sm:$0xff] }
  0x55   : > { %580 = vst [vmem:[%s1163_s17 + $0x1d0] sm:$0xff] %v324_v28  ;;  %581 = vst [vmem:[%s1163_s17 + $0x1d8] sm:$0xff] %v325_v29  ;;  %v366_v28 = vunpack.c.l.bf16 %v188_v14  ;;  %v367_v29 = vunpack.c.h.bf16 %v188_v14  ;;  %v376_v42 = vunpack.c.l.bf16 %v193_v27  ;;  %v377_v43 = vunpack.c.h.bf16 %v193_v27 }
  0x56   : > { %582 = vst [vmem:[%s1163_s17 + $0x1e0] sm:$0xff] %v326_v32  ;;  %583 = vst [vmem:[%s1163_s17 + $0x1e8] sm:$0xff] %v327_v33  ;;  %v194_v32 = vld [vmem:[%s1147_s30 + $0x1c0] sm:$0xff]  ;;  %v195_v33 = vld [vmem:[%s1147_s30 + $0x1c8] sm:$0xff] }
  0x57   : > { %584 = vst [vmem:[%s1163_s17 + $0x1f0] sm:$0xff] %v328_v34  ;;  %585 = vst [vmem:[%s1163_s17 + $0x1f8] sm:$0xff] %v329_v35  ;;  %v370_v34 = vunpack.c.l.bf16 %v190_v20  ;;  %v371_v35 = vunpack.c.h.bf16 %v190_v20  ;;  %v380_v48 = vunpack.c.l.bf16 %v195_v33  ;;  %v381_v49 = vunpack.c.h.bf16 %v195_v33 }
  0x58   : > { %586 = vst [vmem:[%s1163_s17 + $0x200] sm:$0xff] %v330_v38  ;;  %587 = vst [vmem:[%s1163_s17 + $0x208] sm:$0xff] %v331_v39  ;;  %v196_v38 = vld [vmem:[%s1147_s30 + $0x1d0] sm:$0xff]  ;;  %v197_v39 = vld [vmem:[%s1147_s30 + $0x1d8] sm:$0xff] }
  0x59   : > { %588 = vst [vmem:[%s1163_s17 + $0x210] sm:$0xff] %v332_v40  ;;  %589 = vst [vmem:[%s1163_s17 + $0x218] sm:$0xff] %v333_v41  ;;  %v374_v40 = vunpack.c.l.bf16 %v192_v26  ;;  %v375_v41 = vunpack.c.h.bf16 %v192_v26  ;;  %v384_v54 = vunpack.c.l.bf16 %v197_v39  ;;  %v385_v55 = vunpack.c.h.bf16 %v197_v39 }
  0x5a   : > { %590 = vst [vmem:[%s1163_s17 + $0x220] sm:$0xff] %v334_v44  ;;  %591 = vst [vmem:[%s1163_s17 + $0x228] sm:$0xff] %v335_v45  ;;  %v198_v44 = vld [vmem:[%s1147_s30 + $0x1e0] sm:$0xff]  ;;  %v199_v45 = vld [vmem:[%s1147_s30 + $0x1e8] sm:$0xff] }
  0x5b   : > { %592 = vst [vmem:[%s1163_s17 + $0x230] sm:$0xff] %v336_v46  ;;  %593 = vst [vmem:[%s1163_s17 + $0x238] sm:$0xff] %v337_v47  ;;  %v378_v46 = vunpack.c.l.bf16 %v194_v32  ;;  %v379_v47 = vunpack.c.h.bf16 %v194_v32  ;;  %v388_v60 = vunpack.c.l.bf16 %v199_v45  ;;  %v389_v61 = vunpack.c.h.bf16 %v199_v45 }
  0x5c   : > { %594 = vst [vmem:[%s1163_s17 + $0x240] sm:$0xff] %v338_v50  ;;  %595 = vst [vmem:[%s1163_s17 + $0x248] sm:$0xff] %v339_v51  ;;  %v200_v50 = vld [vmem:[%s1147_s30 + $0x1f0] sm:$0xff]  ;;  %v201_v51 = vld [vmem:[%s1147_s30 + $0x1f8] sm:$0xff] }
  0x5d   : > { %596 = vst [vmem:[%s1163_s17 + $0x250] sm:$0xff] %v340_v52  ;;  %597 = vst [vmem:[%s1163_s17 + $0x258] sm:$0xff] %v341_v53  ;;  %v382_v52 = vunpack.c.l.bf16 %v196_v38  ;;  %v383_v53 = vunpack.c.h.bf16 %v196_v38  ;;  %v392_v2 = vunpack.c.l.bf16 %v201_v51  ;;  %v393_v3 = vunpack.c.h.bf16 %v201_v51 }
  0x5e   : > { %598 = vst [vmem:[%s1163_s17 + $0x260] sm:$0xff] %v342_v56  ;;  %599 = vst [vmem:[%s1163_s17 + $0x268] sm:$0xff] %v343_v57  ;;  %v202_v56 = vld [vmem:[%s1147_s30 + $0x200] sm:$0xff]  ;;  %v203_v57 = vld [vmem:[%s1147_s30 + $0x208] sm:$0xff] }
  0x5f   : > { %600 = vst [vmem:[%s1163_s17 + $0x270] sm:$0xff] %v344_v58  ;;  %601 = vst [vmem:[%s1163_s17 + $0x278] sm:$0xff] %v345_v59  ;;  %v386_v58 = vunpack.c.l.bf16 %v198_v44  ;;  %v387_v59 = vunpack.c.h.bf16 %v198_v44  ;;  %v396_v8 = vunpack.c.l.bf16 %v203_v57  ;;  %v397_v9 = vunpack.c.h.bf16 %v203_v57 }
  0x60   : > { %602 = vst [vmem:[%s1163_s17 + $0x280] sm:$0xff] %v346_v62  ;;  %603 = vst [vmem:[%s1163_s17 + $0x288] sm:$0xff] %v347_v63  ;;  %v204_v62 = vld [vmem:[%s1147_s30 + $0x210] sm:$0xff]  ;;  %v205_v63 = vld [vmem:[%s1147_s30 + $0x218] sm:$0xff] }
  0x61   : > { %604 = vst [vmem:[%s1163_s17 + $0x290] sm:$0xff] %v348_v0  ;;  %605 = vst [vmem:[%s1163_s17 + $0x298] sm:$0xff] %v349_v1  ;;  %v390_v0 = vunpack.c.l.bf16 %v200_v50  ;;  %v391_v1 = vunpack.c.h.bf16 %v200_v50  ;;  %v400_v14 = vunpack.c.l.bf16 %v205_v63  ;;  %v401_v15 = vunpack.c.h.bf16 %v205_v63 }
  0x62   : > { %606 = vst [vmem:[%s1163_s17 + $0x2a0] sm:$0xff] %v350_v4  ;;  %607 = vst [vmem:[%s1163_s17 + $0x2a8] sm:$0xff] %v351_v5  ;;  %v206_v4 = vld [vmem:[%s1147_s30 + $0x220] sm:$0xff]  ;;  %v207_v5 = vld [vmem:[%s1147_s30 + $0x228] sm:$0xff] }
  0x63   : > { %608 = vst [vmem:[%s1163_s17 + $0x2b0] sm:$0xff] %v352_v6  ;;  %609 = vst [vmem:[%s1163_s17 + $0x2b8] sm:$0xff] %v353_v7  ;;  %v394_v6 = vunpack.c.l.bf16 %v202_v56  ;;  %v395_v7 = vunpack.c.h.bf16 %v202_v56  ;;  %v404_v20 = vunpack.c.l.bf16 %v207_v5  ;;  %v405_v21 = vunpack.c.h.bf16 %v207_v5 }
  0x64   : > { %610 = vst [vmem:[%s1163_s17 + $0x2c0] sm:$0xff] %v354_v10  ;;  %611 = vst [vmem:[%s1163_s17 + $0x2c8] sm:$0xff] %v355_v11  ;;  %v208_v10 = vld [vmem:[%s1147_s30 + $0x230] sm:$0xff]  ;;  %v209_v11 = vld [vmem:[%s1147_s30 + $0x238] sm:$0xff] }
  0x65   : > { %612 = vst [vmem:[%s1163_s17 + $0x2d0] sm:$0xff] %v356_v12  ;;  %613 = vst [vmem:[%s1163_s17 + $0x2d8] sm:$0xff] %v357_v13  ;;  %v398_v12 = vunpack.c.l.bf16 %v204_v62  ;;  %v399_v13 = vunpack.c.h.bf16 %v204_v62  ;;  %v408_v26 = vunpack.c.l.bf16 %v209_v11  ;;  %v409_v27 = vunpack.c.h.bf16 %v209_v11 }
  0x66   : > { %614 = vst [vmem:[%s1163_s17 + $0x2e0] sm:$0xff] %v358_v16  ;;  %615 = vst [vmem:[%s1163_s17 + $0x2e8] sm:$0xff] %v359_v17  ;;  %v210_v16 = vld [vmem:[%s1147_s30 + $0x240] sm:$0xff]  ;;  %v211_v17 = vld [vmem:[%s1147_s30 + $0x248] sm:$0xff] }
  0x67   : > { %616 = vst [vmem:[%s1163_s17 + $0x2f0] sm:$0xff] %v360_v18  ;;  %617 = vst [vmem:[%s1163_s17 + $0x2f8] sm:$0xff] %v361_v19  ;;  %v402_v18 = vunpack.c.l.bf16 %v206_v4  ;;  %v403_v19 = vunpack.c.h.bf16 %v206_v4  ;;  %v412_v32 = vunpack.c.l.bf16 %v211_v17  ;;  %v413_v33 = vunpack.c.h.bf16 %v211_v17 }
  0x68   : > { %618 = vst [vmem:[%s1163_s17 + $0x300] sm:$0xff] %v362_v22  ;;  %619 = vst [vmem:[%s1163_s17 + $0x308] sm:$0xff] %v363_v23  ;;  %v212_v22 = vld [vmem:[%s1147_s30 + $0x250] sm:$0xff]  ;;  %v213_v23 = vld [vmem:[%s1147_s30 + $0x258] sm:$0xff] }
  0x69   : > { %620 = vst [vmem:[%s1163_s17 + $0x310] sm:$0xff] %v364_v24  ;;  %621 = vst [vmem:[%s1163_s17 + $0x318] sm:$0xff] %v365_v25  ;;  %v406_v24 = vunpack.c.l.bf16 %v208_v10  ;;  %v407_v25 = vunpack.c.h.bf16 %v208_v10  ;;  %v416_v38 = vunpack.c.l.bf16 %v213_v23  ;;  %v417_v39 = vunpack.c.h.bf16 %v213_v23 }
  0x6a   : > { %622 = vst [vmem:[%s1163_s17 + $0x320] sm:$0xff] %v366_v28  ;;  %623 = vst [vmem:[%s1163_s17 + $0x328] sm:$0xff] %v367_v29  ;;  %v214_v28 = vld [vmem:[%s1147_s30 + $0x260] sm:$0xff]  ;;  %v215_v29 = vld [vmem:[%s1147_s30 + $0x268] sm:$0xff] }
  0x6b   : > { %624 = vst [vmem:[%s1163_s17 + $0x330] sm:$0xff] %v368_v30  ;;  %625 = vst [vmem:[%s1163_s17 + $0x338] sm:$0xff] %v369_v31  ;;  %v410_v30 = vunpack.c.l.bf16 %v210_v16  ;;  %v411_v31 = vunpack.c.h.bf16 %v210_v16  ;;  %v420_v44 = vunpack.c.l.bf16 %v215_v29  ;;  %v421_v45 = vunpack.c.h.bf16 %v215_v29 }
  0x6c   : > { %626 = vst [vmem:[%s1163_s17 + $0x340] sm:$0xff] %v370_v34  ;;  %627 = vst [vmem:[%s1163_s17 + $0x348] sm:$0xff] %v371_v35  ;;  %v216_v34 = vld [vmem:[%s1147_s30 + $0x270] sm:$0xff]  ;;  %v217_v35 = vld [vmem:[%s1147_s30 + $0x278] sm:$0xff] }
  0x6d   : > { %628 = vst [vmem:[%s1163_s17 + $0x350] sm:$0xff] %v372_v36  ;;  %629 = vst [vmem:[%s1163_s17 + $0x358] sm:$0xff] %v373_v37  ;;  %v414_v36 = vunpack.c.l.bf16 %v212_v22  ;;  %v415_v37 = vunpack.c.h.bf16 %v212_v22  ;;  %v424_v50 = vunpack.c.l.bf16 %v217_v35  ;;  %v425_v51 = vunpack.c.h.bf16 %v217_v35 }
  0x6e   : > { %630 = vst [vmem:[%s1163_s17 + $0x360] sm:$0xff] %v374_v40  ;;  %631 = vst [vmem:[%s1163_s17 + $0x368] sm:$0xff] %v375_v41  ;;  %v218_v40 = vld [vmem:[%s1147_s30 + $0x280] sm:$0xff]  ;;  %v219_v41 = vld [vmem:[%s1147_s30 + $0x288] sm:$0xff] }
  0x6f   : > { %632 = vst [vmem:[%s1163_s17 + $0x370] sm:$0xff] %v376_v42  ;;  %633 = vst [vmem:[%s1163_s17 + $0x378] sm:$0xff] %v377_v43  ;;  %v418_v42 = vunpack.c.l.bf16 %v214_v28  ;;  %v419_v43 = vunpack.c.h.bf16 %v214_v28  ;;  %v428_v56 = vunpack.c.l.bf16 %v219_v41  ;;  %v429_v57 = vunpack.c.h.bf16 %v219_v41 }
  0x70   : > { %634 = vst [vmem:[%s1163_s17 + $0x380] sm:$0xff] %v378_v46  ;;  %635 = vst [vmem:[%s1163_s17 + $0x388] sm:$0xff] %v379_v47  ;;  %v220_v46 = vld [vmem:[%s1147_s30 + $0x290] sm:$0xff]  ;;  %v221_v47 = vld [vmem:[%s1147_s30 + $0x298] sm:$0xff] }
  0x71   : > { %636 = vst [vmem:[%s1163_s17 + $0x390] sm:$0xff] %v380_v48  ;;  %637 = vst [vmem:[%s1163_s17 + $0x398] sm:$0xff] %v381_v49  ;;  %v422_v48 = vunpack.c.l.bf16 %v216_v34  ;;  %v423_v49 = vunpack.c.h.bf16 %v216_v34  ;;  %v432_v62 = vunpack.c.l.bf16 %v221_v47  ;;  %v433_v63 = vunpack.c.h.bf16 %v221_v47 }
  0x72   : > { %638 = vst [vmem:[%s1163_s17 + $0x3a0] sm:$0xff] %v382_v52  ;;  %639 = vst [vmem:[%s1163_s17 + $0x3a8] sm:$0xff] %v383_v53  ;;  %v222_v52 = vld [vmem:[%s1147_s30 + $0x2a0] sm:$0xff]  ;;  %v223_v53 = vld [vmem:[%s1147_s30 + $0x2a8] sm:$0xff] }
  0x73   : > { %640 = vst [vmem:[%s1163_s17 + $0x3b0] sm:$0xff] %v384_v54  ;;  %641 = vst [vmem:[%s1163_s17 + $0x3b8] sm:$0xff] %v385_v55  ;;  %v426_v54 = vunpack.c.l.bf16 %v218_v40  ;;  %v427_v55 = vunpack.c.h.bf16 %v218_v40  ;;  %v436_v4 = vunpack.c.l.bf16 %v223_v53  ;;  %v437_v5 = vunpack.c.h.bf16 %v223_v53 }
  0x74   : > { %642 = vst [vmem:[%s1163_s17 + $0x3c0] sm:$0xff] %v386_v58  ;;  %643 = vst [vmem:[%s1163_s17 + $0x3c8] sm:$0xff] %v387_v59  ;;  %v224_v58 = vld [vmem:[%s1147_s30 + $0x2b0] sm:$0xff]  ;;  %v225_v59 = vld [vmem:[%s1147_s30 + $0x2b8] sm:$0xff] }
  0x75   : > { %644 = vst [vmem:[%s1163_s17 + $0x3d0] sm:$0xff] %v388_v60  ;;  %645 = vst [vmem:[%s1163_s17 + $0x3d8] sm:$0xff] %v389_v61  ;;  %v430_v60 = vunpack.c.l.bf16 %v220_v46  ;;  %v431_v61 = vunpack.c.h.bf16 %v220_v46  ;;  %v440_v10 = vunpack.c.l.bf16 %v225_v59  ;;  %v441_v11 = vunpack.c.h.bf16 %v225_v59 }
  0x76   : > { %646 = vst [vmem:[%s1163_s17 + $0x3e0] sm:$0xff] %v390_v0  ;;  %647 = vst [vmem:[%s1163_s17 + $0x3e8] sm:$0xff] %v391_v1  ;;  %v226_v0 = vld [vmem:[%s1147_s30 + $0x2c0] sm:$0xff]  ;;  %v227_v1 = vld [vmem:[%s1147_s30 + $0x2c8] sm:$0xff] }
  0x77   : > { %648 = vst [vmem:[%s1163_s17 + $0x3f0] sm:$0xff] %v392_v2  ;;  %649 = vst [vmem:[%s1163_s17 + $0x3f8] sm:$0xff] %v393_v3  ;;  %v434_v2 = vunpack.c.l.bf16 %v222_v52  ;;  %v435_v3 = vunpack.c.h.bf16 %v222_v52  ;;  %v444_v16 = vunpack.c.l.bf16 %v227_v1  ;;  %v445_v17 = vunpack.c.h.bf16 %v227_v1 }
  0x78   : > { %650 = vst [vmem:[%s1163_s17 + $0x400] sm:$0xff] %v394_v6  ;;  %651 = vst [vmem:[%s1163_s17 + $0x408] sm:$0xff] %v395_v7  ;;  %v228_v6 = vld [vmem:[%s1147_s30 + $0x2d0] sm:$0xff]  ;;  %v229_v7 = vld [vmem:[%s1147_s30 + $0x2d8] sm:$0xff] }
  0x79   : > { %652 = vst [vmem:[%s1163_s17 + $0x410] sm:$0xff] %v396_v8  ;;  %653 = vst [vmem:[%s1163_s17 + $0x418] sm:$0xff] %v397_v9  ;;  %v438_v8 = vunpack.c.l.bf16 %v224_v58  ;;  %v439_v9 = vunpack.c.h.bf16 %v224_v58  ;;  %v448_v22 = vunpack.c.l.bf16 %v229_v7  ;;  %v449_v23 = vunpack.c.h.bf16 %v229_v7 }
  0x7a   : > { %654 = vst [vmem:[%s1163_s17 + $0x420] sm:$0xff] %v398_v12  ;;  %655 = vst [vmem:[%s1163_s17 + $0x428] sm:$0xff] %v399_v13  ;;  %v230_v12 = vld [vmem:[%s1147_s30 + $0x2e0] sm:$0xff]  ;;  %v231_v13 = vld [vmem:[%s1147_s30 + $0x2e8] sm:$0xff] }
  0x7b   : > { %656 = vst [vmem:[%s1163_s17 + $0x430] sm:$0xff] %v400_v14  ;;  %657 = vst [vmem:[%s1163_s17 + $0x438] sm:$0xff] %v401_v15  ;;  %v442_v14 = vunpack.c.l.bf16 %v226_v0  ;;  %v443_v15 = vunpack.c.h.bf16 %v226_v0  ;;  %v452_v28 = vunpack.c.l.bf16 %v231_v13  ;;  %v453_v29 = vunpack.c.h.bf16 %v231_v13 }
  0x7c   : > { %658 = vst [vmem:[%s1163_s17 + $0x440] sm:$0xff] %v402_v18  ;;  %659 = vst [vmem:[%s1163_s17 + $0x448] sm:$0xff] %v403_v19  ;;  %v232_v18 = vld [vmem:[%s1147_s30 + $0x2f0] sm:$0xff]  ;;  %v233_v19 = vld [vmem:[%s1147_s30 + $0x2f8] sm:$0xff] }
  0x7d   : > { %660 = vst [vmem:[%s1163_s17 + $0x450] sm:$0xff] %v404_v20  ;;  %661 = vst [vmem:[%s1163_s17 + $0x458] sm:$0xff] %v405_v21  ;;  %v446_v20 = vunpack.c.l.bf16 %v228_v6  ;;  %v447_v21 = vunpack.c.h.bf16 %v228_v6  ;;  %v456_v34 = vunpack.c.l.bf16 %v233_v19  ;;  %v457_v35 = vunpack.c.h.bf16 %v233_v19 }
  0x7e   : > { %662 = vst [vmem:[%s1163_s17 + $0x460] sm:$0xff] %v406_v24  ;;  %663 = vst [vmem:[%s1163_s17 + $0x468] sm:$0xff] %v407_v25  ;;  %v234_v24 = vld [vmem:[%s1147_s30 + $0x300] sm:$0xff]  ;;  %v235_v25 = vld [vmem:[%s1147_s30 + $0x308] sm:$0xff] }
  0x7f   : > { %664 = vst [vmem:[%s1163_s17 + $0x470] sm:$0xff] %v408_v26  ;;  %665 = vst [vmem:[%s1163_s17 + $0x478] sm:$0xff] %v409_v27  ;;  %v450_v26 = vunpack.c.l.bf16 %v230_v12  ;;  %v451_v27 = vunpack.c.h.bf16 %v230_v12  ;;  %v460_v40 = vunpack.c.l.bf16 %v235_v25  ;;  %v461_v41 = vunpack.c.h.bf16 %v235_v25 }
  0x80   : > { %666 = vst [vmem:[%s1163_s17 + $0x480] sm:$0xff] %v410_v30  ;;  %667 = vst [vmem:[%s1163_s17 + $0x488] sm:$0xff] %v411_v31  ;;  %v236_v30 = vld [vmem:[%s1147_s30 + $0x310] sm:$0xff]  ;;  %v237_v31 = vld [vmem:[%s1147_s30 + $0x318] sm:$0xff] }
  0x81   : > { %668 = vst [vmem:[%s1163_s17 + $0x490] sm:$0xff] %v412_v32  ;;  %669 = vst [vmem:[%s1163_s17 + $0x498] sm:$0xff] %v413_v33  ;;  %v454_v32 = vunpack.c.l.bf16 %v232_v18  ;;  %v455_v33 = vunpack.c.h.bf16 %v232_v18  ;;  %v464_v46 = vunpack.c.l.bf16 %v237_v31  ;;  %v465_v47 = vunpack.c.h.bf16 %v237_v31 }
  0x82   : > { %670 = vst [vmem:[%s1163_s17 + $0x4a0] sm:$0xff] %v414_v36  ;;  %671 = vst [vmem:[%s1163_s17 + $0x4a8] sm:$0xff] %v415_v37  ;;  %v238_v36 = vld [vmem:[%s1147_s30 + $0x320] sm:$0xff]  ;;  %v239_v37 = vld [vmem:[%s1147_s30 + $0x328] sm:$0xff] }
  0x83   : > { %672 = vst [vmem:[%s1163_s17 + $0x4b0] sm:$0xff] %v416_v38  ;;  %673 = vst [vmem:[%s1163_s17 + $0x4b8] sm:$0xff] %v417_v39  ;;  %v458_v38 = vunpack.c.l.bf16 %v234_v24  ;;  %v459_v39 = vunpack.c.h.bf16 %v234_v24  ;;  %v468_v52 = vunpack.c.l.bf16 %v239_v37  ;;  %v469_v53 = vunpack.c.h.bf16 %v239_v37 }
  0x84   : > { %674 = vst [vmem:[%s1163_s17 + $0x4c0] sm:$0xff] %v418_v42  ;;  %675 = vst [vmem:[%s1163_s17 + $0x4c8] sm:$0xff] %v419_v43  ;;  %v240_v42 = vld [vmem:[%s1147_s30 + $0x330] sm:$0xff]  ;;  %v241_v43 = vld [vmem:[%s1147_s30 + $0x338] sm:$0xff] }
  0x85   : > { %676 = vst [vmem:[%s1163_s17 + $0x4d0] sm:$0xff] %v420_v44  ;;  %677 = vst [vmem:[%s1163_s17 + $0x4d8] sm:$0xff] %v421_v45  ;;  %v462_v44 = vunpack.c.l.bf16 %v236_v30  ;;  %v463_v45 = vunpack.c.h.bf16 %v236_v30  ;;  %v472_v58 = vunpack.c.l.bf16 %v241_v43  ;;  %v473_v59 = vunpack.c.h.bf16 %v241_v43 }
  0x86   : > { %678 = vst [vmem:[%s1163_s17 + $0x4e0] sm:$0xff] %v422_v48  ;;  %679 = vst [vmem:[%s1163_s17 + $0x4e8] sm:$0xff] %v423_v49  ;;  %v242_v48 = vld [vmem:[%s1147_s30 + $0x340] sm:$0xff]  ;;  %v243_v49 = vld [vmem:[%s1147_s30 + $0x348] sm:$0xff] }
  0x87   : > { %680 = vst [vmem:[%s1163_s17 + $0x4f0] sm:$0xff] %v424_v50  ;;  %681 = vst [vmem:[%s1163_s17 + $0x4f8] sm:$0xff] %v425_v51  ;;  %v466_v50 = vunpack.c.l.bf16 %v238_v36  ;;  %v467_v51 = vunpack.c.h.bf16 %v238_v36  ;;  %v476_v0 = vunpack.c.l.bf16 %v243_v49  ;;  %v477_v1 = vunpack.c.h.bf16 %v243_v49 }
  0x88   : > { %682 = vst [vmem:[%s1163_s17 + $0x500] sm:$0xff] %v426_v54  ;;  %683 = vst [vmem:[%s1163_s17 + $0x508] sm:$0xff] %v427_v55  ;;  %v244_v54 = vld [vmem:[%s1147_s30 + $0x350] sm:$0xff]  ;;  %v245_v55 = vld [vmem:[%s1147_s30 + $0x358] sm:$0xff] }
  0x89   : > { %684 = vst [vmem:[%s1163_s17 + $0x510] sm:$0xff] %v428_v56  ;;  %685 = vst [vmem:[%s1163_s17 + $0x518] sm:$0xff] %v429_v57  ;;  %v470_v56 = vunpack.c.l.bf16 %v240_v42  ;;  %v471_v57 = vunpack.c.h.bf16 %v240_v42  ;;  %v480_v6 = vunpack.c.l.bf16 %v245_v55  ;;  %v481_v7 = vunpack.c.h.bf16 %v245_v55 }
  0x8a   : > { %686 = vst [vmem:[%s1163_s17 + $0x520] sm:$0xff] %v430_v60  ;;  %687 = vst [vmem:[%s1163_s17 + $0x528] sm:$0xff] %v431_v61  ;;  %v246_v60 = vld [vmem:[%s1147_s30 + $0x360] sm:$0xff]  ;;  %v247_v61 = vld [vmem:[%s1147_s30 + $0x368] sm:$0xff] }
  0x8b   : > { %688 = vst [vmem:[%s1163_s17 + $0x530] sm:$0xff] %v432_v62  ;;  %689 = vst [vmem:[%s1163_s17 + $0x538] sm:$0xff] %v433_v63  ;;  %v474_v62 = vunpack.c.l.bf16 %v242_v48  ;;  %v475_v63 = vunpack.c.h.bf16 %v242_v48  ;;  %v484_v12 = vunpack.c.l.bf16 %v247_v61  ;;  %v485_v13 = vunpack.c.h.bf16 %v247_v61 }
  0x8c   : > { %690 = vst [vmem:[%s1163_s17 + $0x540] sm:$0xff] %v434_v2  ;;  %691 = vst [vmem:[%s1163_s17 + $0x548] sm:$0xff] %v435_v3  ;;  %v248_v2 = vld [vmem:[%s1147_s30 + $0x370] sm:$0xff]  ;;  %v249_v3 = vld [vmem:[%s1147_s30 + $0x378] sm:$0xff] }
  0x8d   : > { %692 = vst [vmem:[%s1163_s17 + $0x550] sm:$0xff] %v436_v4  ;;  %693 = vst [vmem:[%s1163_s17 + $0x558] sm:$0xff] %v437_v5  ;;  %v478_v4 = vunpack.c.l.bf16 %v244_v54  ;;  %v479_v5 = vunpack.c.h.bf16 %v244_v54  ;;  %v488_v18 = vunpack.c.l.bf16 %v249_v3  ;;  %v489_v19 = vunpack.c.h.bf16 %v249_v3 }
  0x8e   : > { %694 = vst [vmem:[%s1163_s17 + $0x560] sm:$0xff] %v438_v8  ;;  %695 = vst [vmem:[%s1163_s17 + $0x568] sm:$0xff] %v439_v9  ;;  %v250_v8 = vld [vmem:[%s1147_s30 + $0x380] sm:$0xff]  ;;  %v251_v9 = vld [vmem:[%s1147_s30 + $0x388] sm:$0xff] }
  0x8f   : > { %696 = vst [vmem:[%s1163_s17 + $0x570] sm:$0xff] %v440_v10  ;;  %697 = vst [vmem:[%s1163_s17 + $0x578] sm:$0xff] %v441_v11  ;;  %v482_v10 = vunpack.c.l.bf16 %v246_v60  ;;  %v483_v11 = vunpack.c.h.bf16 %v246_v60  ;;  %v492_v24 = vunpack.c.l.bf16 %v251_v9  ;;  %v493_v25 = vunpack.c.h.bf16 %v251_v9 }
  0x90   : > { %698 = vst [vmem:[%s1163_s17 + $0x580] sm:$0xff] %v442_v14  ;;  %699 = vst [vmem:[%s1163_s17 + $0x588] sm:$0xff] %v443_v15  ;;  %v252_v14 = vld [vmem:[%s1147_s30 + $0x390] sm:$0xff]  ;;  %v253_v15 = vld [vmem:[%s1147_s30 + $0x398] sm:$0xff] }
  0x91   : > { %700 = vst [vmem:[%s1163_s17 + $0x590] sm:$0xff] %v444_v16  ;;  %701 = vst [vmem:[%s1163_s17 + $0x598] sm:$0xff] %v445_v17  ;;  %v486_v16 = vunpack.c.l.bf16 %v248_v2  ;;  %v487_v17 = vunpack.c.h.bf16 %v248_v2  ;;  %v496_v30 = vunpack.c.l.bf16 %v253_v15  ;;  %v497_v31 = vunpack.c.h.bf16 %v253_v15 }
  0x92   : > { %702 = vst [vmem:[%s1163_s17 + $0x5a0] sm:$0xff] %v446_v20  ;;  %703 = vst [vmem:[%s1163_s17 + $0x5a8] sm:$0xff] %v447_v21  ;;  %v254_v20 = vld [vmem:[%s1147_s30 + $0x3a0] sm:$0xff]  ;;  %v255_v21 = vld [vmem:[%s1147_s30 + $0x3a8] sm:$0xff] }
  0x93   : > { %704 = vst [vmem:[%s1163_s17 + $0x5b0] sm:$0xff] %v448_v22  ;;  %705 = vst [vmem:[%s1163_s17 + $0x5b8] sm:$0xff] %v449_v23  ;;  %v490_v22 = vunpack.c.l.bf16 %v250_v8  ;;  %v491_v23 = vunpack.c.h.bf16 %v250_v8  ;;  %v500_v36 = vunpack.c.l.bf16 %v255_v21  ;;  %v501_v37 = vunpack.c.h.bf16 %v255_v21 }
  0x94   : > { %706 = vst [vmem:[%s1163_s17 + $0x5c0] sm:$0xff] %v450_v26  ;;  %707 = vst [vmem:[%s1163_s17 + $0x5c8] sm:$0xff] %v451_v27  ;;  %v256_v26 = vld [vmem:[%s1147_s30 + $0x3b0] sm:$0xff]  ;;  %v257_v27 = vld [vmem:[%s1147_s30 + $0x3b8] sm:$0xff] }
  0x95   : > { %708 = vst [vmem:[%s1163_s17 + $0x5d0] sm:$0xff] %v452_v28  ;;  %709 = vst [vmem:[%s1163_s17 + $0x5d8] sm:$0xff] %v453_v29  ;;  %v494_v28 = vunpack.c.l.bf16 %v252_v14  ;;  %v495_v29 = vunpack.c.h.bf16 %v252_v14  ;;  %v504_v42 = vunpack.c.l.bf16 %v257_v27  ;;  %v505_v43 = vunpack.c.h.bf16 %v257_v27 }
  0x96   : > { %710 = vst [vmem:[%s1163_s17 + $0x5e0] sm:$0xff] %v454_v32  ;;  %711 = vst [vmem:[%s1163_s17 + $0x5e8] sm:$0xff] %v455_v33  ;;  %v258_v32 = vld [vmem:[%s1147_s30 + $0x3c0] sm:$0xff]  ;;  %v259_v33 = vld [vmem:[%s1147_s30 + $0x3c8] sm:$0xff] }
  0x97   : > { %712 = vst [vmem:[%s1163_s17 + $0x5f0] sm:$0xff] %v456_v34  ;;  %713 = vst [vmem:[%s1163_s17 + $0x5f8] sm:$0xff] %v457_v35  ;;  %v498_v34 = vunpack.c.l.bf16 %v254_v20  ;;  %v499_v35 = vunpack.c.h.bf16 %v254_v20  ;;  %v508_v48 = vunpack.c.l.bf16 %v259_v33  ;;  %v509_v49 = vunpack.c.h.bf16 %v259_v33 }
  0x98   : > { %714 = vst [vmem:[%s1163_s17 + $0x600] sm:$0xff] %v458_v38  ;;  %715 = vst [vmem:[%s1163_s17 + $0x608] sm:$0xff] %v459_v39  ;;  %v260_v38 = vld [vmem:[%s1147_s30 + $0x3d0] sm:$0xff]  ;;  %v261_v39 = vld [vmem:[%s1147_s30 + $0x3d8] sm:$0xff] }
  0x99   : > { %716 = vst [vmem:[%s1163_s17 + $0x610] sm:$0xff] %v460_v40  ;;  %717 = vst [vmem:[%s1163_s17 + $0x618] sm:$0xff] %v461_v41  ;;  %v502_v40 = vunpack.c.l.bf16 %v256_v26  ;;  %v503_v41 = vunpack.c.h.bf16 %v256_v26  ;;  %v512_v54 = vunpack.c.l.bf16 %v261_v39  ;;  %v513_v55 = vunpack.c.h.bf16 %v261_v39 }
  0x9a   : > { %718 = vst [vmem:[%s1163_s17 + $0x620] sm:$0xff] %v462_v44  ;;  %719 = vst [vmem:[%s1163_s17 + $0x628] sm:$0xff] %v463_v45  ;;  %v262_v44 = vld [vmem:[%s1147_s30 + $0x3e0] sm:$0xff]  ;;  %v263_v45 = vld [vmem:[%s1147_s30 + $0x3e8] sm:$0xff] }
  0x9b   : > { %720 = vst [vmem:[%s1163_s17 + $0x630] sm:$0xff] %v464_v46  ;;  %721 = vst [vmem:[%s1163_s17 + $0x638] sm:$0xff] %v465_v47  ;;  %v506_v46 = vunpack.c.l.bf16 %v258_v32  ;;  %v507_v47 = vunpack.c.h.bf16 %v258_v32 }
  0x9c   : > { %722 = vst [vmem:[%s1163_s17 + $0x640] sm:$0xff] %v466_v50  ;;  %723 = vst [vmem:[%s1163_s17 + $0x648] sm:$0xff] %v467_v51  ;;  %v264_v50 = vld [vmem:[%s1147_s30 + $0x3f0] sm:$0xff]  ;;  %v265_v51 = vld [vmem:[%s1147_s30 + $0x3f8] sm:$0xff] }
  0x9d   : > { %724 = vst [vmem:[%s1163_s17 + $0x650] sm:$0xff] %v468_v52  ;;  %725 = vst [vmem:[%s1163_s17 + $0x658] sm:$0xff] %v469_v53  ;;  %v510_v52 = vunpack.c.l.bf16 %v260_v38  ;;  %v511_v53 = vunpack.c.h.bf16 %v260_v38  ;;  %v518_v60 = vunpack.c.l.bf16 %v264_v50  ;;  %v519_v61 = vunpack.c.h.bf16 %v264_v50 }
  0x9e   : > { %726 = vst [vmem:[%s1163_s17 + $0x660] sm:$0xff] %v470_v56  ;;  %727 = vst [vmem:[%s1163_s17 + $0x668] sm:$0xff] %v471_v57  ;;  %v514_v56 = vunpack.c.l.bf16 %v262_v44  ;;  %v515_v57 = vunpack.c.h.bf16 %v262_v44 }
  0x9f   : > { %728 = vst [vmem:[%s1163_s17 + $0x670] sm:$0xff] %v472_v58  ;;  %729 = vst [vmem:[%s1163_s17 + $0x678] sm:$0xff] %v473_v59  ;;  %v516_v58 = vunpack.c.l.bf16 %v263_v45  ;;  %v517_v59 = vunpack.c.h.bf16 %v263_v45 }
  0xa0   : > { %730 = vst [vmem:[%s1163_s17 + $0x680] sm:$0xff] %v474_v62  ;;  %731 = vst [vmem:[%s1163_s17 + $0x688] sm:$0xff] %v475_v63  ;;  %v520_v62 = vunpack.c.l.bf16 %v265_v51  ;;  %v521_v63 = vunpack.c.h.bf16 %v265_v51 }
  0xa1   : > { %732 = vst [vmem:[%s1163_s17 + $0x690] sm:$0xff] %v476_v0  ;;  %733 = vst [vmem:[%s1163_s17 + $0x698] sm:$0xff] %v477_v1 }
  0xa2   : > { %734 = vst [vmem:[%s1163_s17 + $0x6a0] sm:$0xff] %v478_v4  ;;  %735 = vst [vmem:[%s1163_s17 + $0x6a8] sm:$0xff] %v479_v5 }
  0xa3   : > { %736 = vst [vmem:[%s1163_s17 + $0x6b0] sm:$0xff] %v480_v6  ;;  %737 = vst [vmem:[%s1163_s17 + $0x6b8] sm:$0xff] %v481_v7 }
  0xa4   : > { %738 = vst [vmem:[%s1163_s17 + $0x6c0] sm:$0xff] %v482_v10  ;;  %739 = vst [vmem:[%s1163_s17 + $0x6c8] sm:$0xff] %v483_v11 }
  0xa5   : > { %740 = vst [vmem:[%s1163_s17 + $0x6d0] sm:$0xff] %v484_v12  ;;  %741 = vst [vmem:[%s1163_s17 + $0x6d8] sm:$0xff] %v485_v13 }
  0xa6   : > { %742 = vst [vmem:[%s1163_s17 + $0x6e0] sm:$0xff] %v486_v16  ;;  %743 = vst [vmem:[%s1163_s17 + $0x6e8] sm:$0xff] %v487_v17 }
  0xa7   : > { %744 = vst [vmem:[%s1163_s17 + $0x6f0] sm:$0xff] %v488_v18  ;;  %745 = vst [vmem:[%s1163_s17 + $0x6f8] sm:$0xff] %v489_v19 }
  0xa8   : > { %746 = vst [vmem:[%s1163_s17 + $0x700] sm:$0xff] %v490_v22  ;;  %747 = vst [vmem:[%s1163_s17 + $0x708] sm:$0xff] %v491_v23 }
  0xa9   : > { %748 = vst [vmem:[%s1163_s17 + $0x710] sm:$0xff] %v492_v24  ;;  %749 = vst [vmem:[%s1163_s17 + $0x718] sm:$0xff] %v493_v25 }
  0xaa   : > { %750 = vst [vmem:[%s1163_s17 + $0x720] sm:$0xff] %v494_v28  ;;  %751 = vst [vmem:[%s1163_s17 + $0x728] sm:$0xff] %v495_v29 }
  0xab   : > { %752 = vst [vmem:[%s1163_s17 + $0x730] sm:$0xff] %v496_v30  ;;  %753 = vst [vmem:[%s1163_s17 + $0x738] sm:$0xff] %v497_v31 }
  0xac   : > { %754 = vst [vmem:[%s1163_s17 + $0x740] sm:$0xff] %v498_v34  ;;  %755 = vst [vmem:[%s1163_s17 + $0x748] sm:$0xff] %v499_v35 }
  0xad   : > { %756 = vst [vmem:[%s1163_s17 + $0x750] sm:$0xff] %v500_v36  ;;  %757 = vst [vmem:[%s1163_s17 + $0x758] sm:$0xff] %v501_v37 }
  0xae   : > { %758 = vst [vmem:[%s1163_s17 + $0x760] sm:$0xff] %v502_v40  ;;  %759 = vst [vmem:[%s1163_s17 + $0x768] sm:$0xff] %v503_v41 }
  0xaf   : > { %760 = vst [vmem:[%s1163_s17 + $0x770] sm:$0xff] %v504_v42  ;;  %761 = vst [vmem:[%s1163_s17 + $0x778] sm:$0xff] %v505_v43 }
  0xb0   : > { %762 = vst [vmem:[%s1163_s17 + $0x780] sm:$0xff] %v506_v46  ;;  %763 = vst [vmem:[%s1163_s17 + $0x788] sm:$0xff] %v507_v47 }
  0xb1   : > { %764 = vst [vmem:[%s1163_s17 + $0x790] sm:$0xff] %v508_v48  ;;  %765 = vst [vmem:[%s1163_s17 + $0x798] sm:$0xff] %v509_v49 }
  0xb2   : > { %766 = vst [vmem:[%s1163_s17 + $0x7a0] sm:$0xff] %v510_v52  ;;  %767 = vst [vmem:[%s1163_s17 + $0x7a8] sm:$0xff] %v511_v53 }
  0xb3   : > { %768 = vst [vmem:[%s1163_s17 + $0x7b0] sm:$0xff] %v512_v54  ;;  %769 = vst [vmem:[%s1163_s17 + $0x7b8] sm:$0xff] %v513_v55 }
  0xb4   : > { %770 = vst [vmem:[%s1163_s17 + $0x7c0] sm:$0xff] %v514_v56  ;;  %771 = vst [vmem:[%s1163_s17 + $0x7c8] sm:$0xff] %v515_v57 }
  0xb5   : > { %772 = vst [vmem:[%s1163_s17 + $0x7d0] sm:$0xff] %v516_v58  ;;  %773 = vst [vmem:[%s1163_s17 + $0x7d8] sm:$0xff] %v517_v59 }
  0xb6   : > { %774 = vst [vmem:[%s1163_s17 + $0x7e0] sm:$0xff] %v518_v60  ;;  %775 = vst [vmem:[%s1163_s17 + $0x7e8] sm:$0xff] %v519_v61 }
  0xb7   : > { %776 = vst [vmem:[%s1163_s17 + $0x7f0] sm:$0xff] %v520_v62  ;;  %777 = vst [vmem:[%s1163_s17 + $0x7f8] sm:$0xff] %v521_v63 }
  0xb8   : > { %977 = shalt.err (!%p974_p10)
}
  0xb9   : > { %s978_s14 = scalar_lea.hbm %s1533_s2, 32768  ;;  %s982_s21 = scalar_lea.hbm %s1591_s1, 65536 }
  0xba   : > { %p979_p0 = scmp.ne.s32.totalorder %s1533_s2, %s978_s14  ;;  %p983_p1 = scmp.lt.s32.totalorder %s1533_s2, %s1591_s1 }
  0xbb   : > { %p984_p3 = scmp.lt.s32.totalorder %s982_s21, %s978_s14 }
  0xbc   : > { %p980_p2 = pnand %p979_p0, %p1600_p12 }
  0xbd   : > { %p985_p6 = por %p984_p3, %p983_p1 }
  0xbe   : > { %p981_p9 = pneg %p980_p2 }
  0xc0   : > { %p986_p11 = pnand %p985_p6, %p981_p9 }
  0xc2   : > { %989 = shalt.err (!%p986_p11)
}
  0xc3   : > { %s1034_s26 = smov 2048   ;;  %s1035_s30 = smov 128  }
  0xc4   : > { %888 = dma.vmem_to_hbm [thread:$0]  (%p1600_p12), %s1535_s28, 32768, %s1533_s2, %s779_s3, %s1034_s26, %s1034_s26, %s1035_s30  }
  0xc5 PF: > { %s808_s25 = sand.u32 1, %s1016_s6   ;;  %p1601_p13 = scmp.ne.s32.totalorder %s1597_s19, 0 }
  0xc6   : > { %p1602_p4 = scmp.ge.s32.totalorder %s1028_s9, 2  ;;  %s809_s17 = scalar_lea.sflag [#allocation4], %s808_s25 }
  0xc8   : > { %p895_p5 = pnand %p1602_p4, %p1601_p13 }
  0xca   : > { %p896_p7 = pneg %p895_p5 }
  0xcc   : > { %1011 = dma.done.wait (%p896_p7), %s809_s17, 32768  }
  0xcd   : > { %1013 = vsyncadd (%p896_p7), %s809_s17, 4294934528  ;;  %p14_p8 = scmp.ge.s32.totalorder %s1071_s12, 4   ;;  %s1603_s6 = smov %s1020_s7 }
  0xce   : > { %s1604_s7 = smov %s1024_s8  ;;  %s1605_s8 = smov %s1083_s15 }
  0xcf   : > { %s1606_s9 = smov %s1071_s12  ;;  %16 = sbr.rel (!%p14_p8) target bundleno = 5 (0x5), region = 69 }
  0xd4   :  { %814 = vsyncpa [#allocation3], 1 }
  0xd5   :  { %816 = vsyncpa [#allocation3 + $0x1], 1 }
  0xd6   :  { %817 = vsyncpa [#allocation4], 1 }
  0xd7   :  { %819 = vsyncpa [#allocation4 + $0x1], 1 }

</bundles_post_ra>
